<compile_context>
chip_gen: v7x
topology: tpu7x:2x2x1
jax: 0.10.0
libtpu: 0.0.40
codegen_flags: <defaults>
</compile_context>

<pallas_src>
import functools
import math

import jax
import jax.numpy as jnp
from jax.experimental import pallas as pl
from jax.experimental.pallas import tpu as pltpu


SEG = 128  # lane width of each packed segment (weight slab columns / output slab segments)


def _round_up(n, m):
    return ((n + m - 1) // m) * m


# -----------------------------------------------------------------------------
# Fused forward kernel (single shot, everything VMEM resident)
# -----------------------------------------------------------------------------
def _fused_forward_kernel(
    x_ref,        # [B, D_in]          f32
    noise_ref,    # [B, D_enc]         f32 (Laplace noise, zeros if noise_layer=False)
    w_ref,        # [R, SEG]           packed weights+biases (param_dtype)
    out_ref,      # [B, 3*SEG]         f32 output slab
    *,
    d_in, h_enc, d_enc, n_hh, n_ho,
    r_ew1, r_ew2, r_hw1, r_hw2, r_bias,
    noise_layer: bool,
    norm_eps: float,
    param_dtype,
):
    x = x_ref[...].astype(param_dtype)

    # Static slices of the packed weight slab (free views, no extra DMA).
    enc_w1 = w_ref[r_ew1:r_ew1 + d_in, 0:h_enc]
    enc_w2 = w_ref[r_ew2:r_ew2 + h_enc, 0:d_enc]
    head_w1 = w_ref[r_hw1:r_hw1 + d_enc, 0:n_hh]
    head_w2 = w_ref[r_hw2:r_hw2 + n_hh, 0:n_ho]
    enc_b1 = w_ref[r_bias + 0:r_bias + 1, 0:h_enc].astype(jnp.float32)
    enc_b2 = w_ref[r_bias + 1:r_bias + 2, 0:d_enc].astype(jnp.float32)
    head_b1 = w_ref[r_bias + 2:r_bias + 3, 0:n_hh].astype(jnp.float32)
    head_b2 = w_ref[r_bias + 3:r_bias + 4, 0:n_ho].astype(jnp.float32)

    # ---- encoder: relu(x @ W1 + b1) -> (h @ W2 + b2). Dropout == identity (eval).
    h = jnp.dot(x, enc_w1, preferred_element_type=jnp.float32) + enc_b1
    h = jnp.maximum(h, 0.0)
    original_hidden = (
        jnp.dot(h.astype(param_dtype), enc_w2, preferred_element_type=jnp.float32) + enc_b2
    )

    if noise_layer:
        # hidden = x / ||x||_2 (per-row, dim=1, keepdim) + Laplace(0, 2/eps) noise
        sq = jnp.sum(original_hidden * original_hidden, axis=1, keepdims=True)
        inv_norm = jax.lax.rsqrt(jnp.maximum(sq, norm_eps))   # EUP; eps avoids NaN on 0-rows
        hidden = original_hidden * inv_norm + noise_ref[...].astype(jnp.float32)
    else:
        hidden = original_hidden

    # ---- heads, layer 1: one lane-dense [B, D_enc] @ [D_enc, 4*H] matmul for all 4 heads.
    hh = (
        jnp.dot(hidden.astype(param_dtype), head_w1, preferred_element_type=jnp.float32)
        + head_b1
    )
    hh = jnp.maximum(hh, 0.0)

    # ---- heads, layer 2: block-diagonal [4*H, 4*PAD] matmul.
    ho = (
        jnp.dot(hh.astype(param_dtype), head_w2, preferred_element_type=jnp.float32)
        + head_b2
    )

    # ---- single lane-dense output slab: [ hidden(pad 128) | heads_hidden(128) | heads_out(128) ]
    b = x_ref.shape[0]

    def _pad(v, width):
        if v.shape[1] == width:
            return v
        return jnp.concatenate([v, jnp.zeros((b, width - v.shape[1]), jnp.float32)], axis=1)

    out_ref[...] = jnp.concatenate(
        [_pad(hidden, SEG), _pad(hh, SEG), _pad(ho, SEG)], axis=1
    ).astype(out_ref.dtype)


def fused_forward(weight_slab, meta, x, noise, *, noise_layer, norm_eps=1e-24):
    B = x.shape[0]
    kernel = functools.partial(
        _fused_forward_kernel,
        d_in=meta["d_in"], h_enc=meta["h_enc"], d_enc=meta["d_enc"],
        n_hh=meta["n_hh"], n_ho=meta["n_ho"],
        r_ew1=meta["r_ew1"], r_ew2=meta["r_ew2"],
        r_hw1=meta["r_hw1"], r_hw2=meta["r_hw2"], r_bias=meta["r_bias"],
        noise_layer=noise_layer,
        norm_eps=norm_eps,
        param_dtype=meta["param_dtype"],
    )
    vmem = pl.BlockSpec(memory_space=pltpu.MemorySpace.VMEM)
    return pl.pallas_call(
        kernel,
        out_shape=jax.ShapeDtypeStruct((B, 3 * SEG), jnp.float32),
        in_specs=[vmem, vmem, vmem],
        out_specs=vmem,
    )(x, noise, weight_slab)


# -----------------------------------------------------------------------------
# Parameter construction (mirrors initialize_parameters: xavier-uniform W, zero b)
# -----------------------------------------------------------------------------
def _xavier_uniform(key, fan_in, fan_out, dtype=jnp.float32):
    bound = math.sqrt(6.0 / (fan_in + fan_out))
    return jax.random.uniform(key, (fan_in, fan_out), dtype, -bound, bound)


def init_mlp(key, dims):
    """dims = [in, hidden..., out] -> list of (W [in,out], b [1,out])."""
    layers = []
    for i in range(len(dims) - 1):
        key, wk = jax.random.split(key)
        layers.append((_xavier_uniform(wk, dims[i], dims[i + 1]),
                       jnp.zeros((1, dims[i + 1]), jnp.float32)))
    return layers


def pack_params(params, head_pad=None, param_dtype=jnp.float32):
    """Pack the encoder + 4 heads (classifier, adv_1..3) into ONE [R, 128] weight slab.

    Row layout (row offsets 8-aligned):
      [r_ew1 : +D_in ] cols 0:H      enc_w1
      [r_ew2 : +H    ] cols 0:D_enc  enc_w2
      [r_hw1 : +D_enc] cols 0:4H     heads layer-1 weights, concatenated along D_out
      [r_hw2 : +4H   ] cols 0:4*PAD  heads layer-2 weights, block-diagonal (per-head PAD lanes)
      [r_bias+0..3   ]               enc_b1 | enc_b2 | head_b1 | head_b2 (one row each)

    param_dtype=jnp.bfloat16 halves weight bytes on v6e/v7x; accumulation stays f32.
    """
    (enc_w1, enc_b1), (enc_w2, enc_b2) = params["encoder"]
    heads = [params["classifier"], params["adv_1"], params["adv_2"], params["adv_3"]]
    n_heads = len(heads)

    d_in, h_enc = enc_w1.shape
    d_enc = enc_w2.shape[1]
    hdim = heads[0][0][0].shape[1]                     # per-head hidden dim
    if head_pad is None:
        head_pad = SEG // n_heads
    assert max(h[1][0].shape[1] for h in heads) <= head_pad

    head_w1 = jnp.concatenate([h[0][0] for h in heads], axis=1)   # [D_enc, 4H]
    head_b1 = jnp.concatenate([h[0][1] for h in heads], axis=1)   # [1, 4H]
    n_hh = n_heads * hdim
    n_ho = n_heads * head_pad

    head_w2 = jnp.zeros((n_hh, n_ho), jnp.float32)
    head_b2 = jnp.zeros((1, n_ho), jnp.float32)
    out_slices = []
    for k, head in enumerate(heads):
        w2, b2 = head[1]
        dout = w2.shape[1]
        r0, c0 = k * hdim, k * head_pad
        head_w2 = head_w2.at[r0:r0 + hdim, c0:c0 + dout].set(w2)
        head_b2 = head_b2.at[:, c0:c0 + dout].set(b2)
        out_slices.append((c0, dout))

    assert max(h_enc, d_enc, n_hh, n_ho) <= SEG

    r_ew1 = 0
    r_ew2 = _round_up(r_ew1 + d_in, 8)
    r_hw1 = _round_up(r_ew2 + h_enc, 8)
    r_hw2 = _round_up(r_hw1 + d_enc, 8)
    r_bias = _round_up(r_hw2 + n_hh, 8)
    n_rows = _round_up(r_bias + 4, 8)

    slab = jnp.zeros((n_rows, SEG), jnp.float32)
    slab = slab.at[r_ew1:r_ew1 + d_in, 0:h_enc].set(enc_w1)
    slab = slab.at[r_ew2:r_ew2 + h_enc, 0:d_enc].set(enc_w2)
    slab = slab.at[r_hw1:r_hw1 + d_enc, 0:n_hh].set(head_w1)
    slab = slab.at[r_hw2:r_hw2 + n_hh, 0:n_ho].set(head_w2)
    slab = slab.at[r_bias + 0, 0:h_enc].set(enc_b1[0])
    slab = slab.at[r_bias + 1, 0:d_enc].set(enc_b2[0])
    slab = slab.at[r_bias + 2, 0:n_hh].set(head_b1[0])
    slab = slab.at[r_bias + 3, 0:n_ho].set(head_b2[0])
    slab = slab.astype(param_dtype)

    meta = dict(
        d_in=d_in, h_enc=h_enc, d_enc=d_enc, n_hh=n_hh, n_ho=n_ho,
        r_ew1=r_ew1, r_ew2=r_ew2, r_hw1=r_hw1, r_hw2=r_hw2, r_bias=r_bias,
        hdim=hdim, out_slices=out_slices, param_dtype=param_dtype,
    )
    return slab, meta


# -----------------------------------------------------------------------------
# LinearAdvEncodedEmoji forward
# -----------------------------------------------------------------------------
def linear_adv_encoded_emoji_forward(weight_slab, meta, text, *,
                                     gradient_reversal=True, noise_layer=True,
                                     eps=5.0, rng_key=None):
    # TODO(synk): GradReverse only flips gradients in backward; forward is identity, so
    #             `gradient_reversal` has no effect on this forward-only implementation.
    del gradient_reversal
    B = text.shape[0]
    d_enc = meta["d_enc"]

    if noise_layer:
        assert rng_key is not None
        # torch.distributions.Laplace(0, laplace(eps, 2)) == Laplace(0, 2/eps)
        noise = jax.random.laplace(rng_key, (B, d_enc), jnp.float32) * (2.0 / eps)
    else:
        noise = jnp.zeros((B, d_enc), jnp.float32)

    out_slab = fused_forward(weight_slab, meta, text, noise, noise_layer=noise_layer)

    hidden = out_slab[:, 0:d_enc]
    heads_hidden = out_slab[:, SEG:SEG + meta["n_hh"]]
    heads_out = out_slab[:, 2 * SEG:2 * SEG + meta["n_ho"]]

    (c_cls, n_cls), (c1, n1), (c2, n2), (c3, n3) = meta["out_slices"]
    prediction = heads_out[:, c_cls:c_cls + n_cls]
    adv_output_1 = heads_out[:, c1:c1 + n1]
    adv_output_2 = heads_out[:, c2:c2 + n2]
    adv_output_3 = heads_out[:, c3:c3 + n3]

    h = meta["hdim"]
    adv_hidden_1 = heads_hidden[:, 1 * h:2 * h]
    adv_hidden_2 = heads_hidden[:, 2 * h:3 * h]
    adv_hidden_3 = heads_hidden[:, 3 * h:4 * h]

    return {
        "prediction": prediction,
        "hidden": hidden,
        "adv_output_1": adv_output_1,
        "adv_output_2": adv_output_2,
        "adv_output_3": adv_output_3,
        "adv_other_layer_output_1": [adv_hidden_1, adv_output_1],
        "adv_other_layer_output_2": [adv_hidden_2, adv_output_2],
        "adv_other_layer_output_3": [adv_hidden_3, adv_output_3],
    }


# -----------------------------------------------------------------------------
# Pure-JAX reference for correctness checking
# -----------------------------------------------------------------------------
def _ref_mlp(layers, x):
    n = len(layers)
    for i, (w, b) in enumerate(layers):
        x = jnp.dot(x, w, precision=jax.lax.Precision.HIGHEST) + b
        if i != n - 1:
            x = jnp.maximum(x, 0.0)       # dropout == identity in forward
    return x


def _ref_head_hidden(head_layers, x):
    w1, b1 = head_layers[0]
    return jnp.maximum(jnp.dot(x, w1, precision=jax.lax.Precision.HIGHEST) + b1, 0.0)


# -----------------------------------------------------------------------------
# Main
# -----------------------------------------------------------------------------
if __name__ == "__main__":
    # Small synthetic architecture consistent with the module:
    #   encoder:    2 layers, 32 -> 32 -> 32
    #   classifier: 2 layers, 32 -> 32 -> 4
    #   adv (x3):   2 layers, 32 -> 32 -> 2
    B, INPUT_DIM, HIDDEN, ENC_OUT, N_CLASSES, ADV_OUT = 8, 32, 32, 32, 4, 2
    EPS = 5.0

    root = jax.random.PRNGKey(0)
    k_enc, k_cls, k_a1, k_a2, k_a3, k_x, k_noise = jax.random.split(root, 7)

    params = {
        "encoder":    init_mlp(k_enc, [INPUT_DIM, HIDDEN, ENC_OUT]),
        "classifier": init_mlp(k_cls, [ENC_OUT, HIDDEN, N_CLASSES]),
        "adv_1":      init_mlp(k_a1,  [ENC_OUT, HIDDEN, ADV_OUT]),
        "adv_2":      init_mlp(k_a2,  [ENC_OUT, HIDDEN, ADV_OUT]),
        "adv_3":      init_mlp(k_a3,  [ENC_OUT, HIDDEN, ADV_OUT]),
    }

    weight_slab, meta = pack_params(params)           # param_dtype=f32 (use bf16 on v6e/v7x)
    x = jax.random.normal(k_x, (B, INPUT_DIM), jnp.float32)

    # --- full forward (normalize + Laplace noise path) ---
    out = linear_adv_encoded_emoji_forward(
        weight_slab, meta, x,
        gradient_reversal=True, noise_layer=True, eps=EPS, rng_key=k_noise)
    out = jax.block_until_ready(out)

    assert out["prediction"].shape == (B, N_CLASSES)
    assert out["hidden"].shape == (B, ENC_OUT)
    assert out["adv_output_1"].shape == (B, ADV_OUT)
    assert out["adv_output_2"].shape == (B, ADV_OUT)
    assert out["adv_output_3"].shape == (B, ADV_OUT)
    assert len(out["adv_other_layer_output_1"]) == 2
    assert out["adv_other_layer_output_1"][0].shape == (B, HIDDEN)
    assert bool(jnp.all(jnp.isfinite(out["prediction"])))
    assert bool(jnp.all(jnp.isfinite(out["hidden"])))

    # Reference using the SAME Laplace noise draw (same key/shape/dtype as the wrapper).
    noise_ref = jax.random.laplace(k_noise, (B, ENC_OUT), jnp.float32) * (2.0 / EPS)
    hid0 = _ref_mlp(params["encoder"], x)
    norm = jnp.sqrt(jnp.sum(hid0 * hid0, axis=1, keepdims=True))
    hid_noisy_ref = hid0 / jnp.maximum(norm, 1e-12) + noise_ref

    # Tolerance accounts for possible reduced-precision MXU passes for f32 matmuls.
    TOL = dict(atol=5e-3, rtol=5e-3)
    assert jnp.allclose(out["hidden"], hid_noisy_ref, **TOL)
    assert jnp.allclose(out["prediction"], _ref_mlp(params["classifier"], hid_noisy_ref), **TOL)
    assert jnp.allclose(out["adv_output_1"], _ref_mlp(params["adv_1"], hid_noisy_ref), **TOL)
    assert jnp.allclose(out["adv_output_2"], _ref_mlp(params["adv_2"], hid_noisy_ref), **TOL)
    assert jnp.allclose(out["adv_output_3"], _ref_mlp(params["adv_3"], hid_noisy_ref), **TOL)
    assert jnp.allclose(out["adv_other_layer_output_1"][0],
                        _ref_head_hidden(params["adv_1"], hid_noisy_ref), **TOL)
    assert jnp.allclose(out["adv_other_layer_output_3"][0],
                        _ref_head_hidden(params["adv_3"], hid_noisy_ref), **TOL)

    # --- deterministic (noise_layer=False) path vs pure-JAX reference ---
    out_nf = linear_adv_encoded_emoji_forward(
        weight_slab, meta, x,
        gradient_reversal=False, noise_layer=False, eps=EPS)
    out_nf = jax.block_until_ready(out_nf)

    assert jnp.allclose(out_nf["hidden"], hid0, **TOL)
    assert jnp.allclose(out_nf["prediction"], _ref_mlp(params["classifier"], hid0), **TOL)
    assert jnp.allclose(out_nf["adv_output_1"], _ref_mlp(params["adv_1"], hid0), **TOL)
    assert jnp.allclose(out_nf["adv_output_2"], _ref_mlp(params["adv_2"], hid0), **TOL)
    assert jnp.allclose(out_nf["adv_output_3"], _ref_mlp(params["adv_3"], hid0), **TOL)

    print("KERNEL_OK")
</pallas_src>

<mosaic_0001>
module attributes {stable_mosaic.version = 11 : i64} {
  func.func @_fused_forward_kernel(%arg0: memref<8x32xf32, #tpu.memory_space<vmem>>, %arg1: memref<8x32xf32, #tpu.memory_space<vmem>>, %arg2: memref<232x128xf32, #tpu.memory_space<vmem>>, %arg3: memref<8x384xf32, #tpu.memory_space<vmem>>) attributes {dimension_semantics = [], scalar_prefetch = 0 : i64, scratch_operands = 0 : i64, tpu.core_type = #tpu.core_type<tc>} {
    %c0 = arith.constant 0 : index
    %c0_0 = arith.constant 0 : index
    %0 = vector.load %arg0[%c0, %c0_0] : memref<8x32xf32, #tpu.memory_space<vmem>>, vector<8x32xf32>
    %c0_1 = arith.constant 0 : index
    %c0_2 = arith.constant 0 : index
    %1 = vector.load %arg2[%c0_1, %c0_2] : memref<232x128xf32, #tpu.memory_space<vmem>>, vector<32x32xf32>
    %c32 = arith.constant 32 : index
    %c0_3 = arith.constant 0 : index
    %2 = vector.load %arg2[%c32, %c0_3] : memref<232x128xf32, #tpu.memory_space<vmem>>, vector<32x32xf32>
    %c64 = arith.constant 64 : index
    %c0_4 = arith.constant 0 : index
    %3 = vector.load %arg2[%c64, %c0_4] : memref<232x128xf32, #tpu.memory_space<vmem>>, vector<32x128xf32>
    %c96 = arith.constant 96 : index
    %c0_5 = arith.constant 0 : index
    %4 = vector.load %arg2[%c96, %c0_5] : memref<232x128xf32, #tpu.memory_space<vmem>>, vector<128x128xf32>
    %c224 = arith.constant 224 : index
    %c0_6 = arith.constant 0 : index
    %5 = vector.load %arg2[%c224, %c0_6] : memref<232x128xf32, #tpu.memory_space<vmem>>, vector<1x32xf32>
    %c225 = arith.constant 225 : index
    %c0_7 = arith.constant 0 : index
    %6 = vector.load %arg2[%c225, %c0_7] : memref<232x128xf32, #tpu.memory_space<vmem>>, vector<1x32xf32>
    %c226 = arith.constant 226 : index
    %c0_8 = arith.constant 0 : index
    %7 = vector.load %arg2[%c226, %c0_8] : memref<232x128xf32, #tpu.memory_space<vmem>>, vector<1x128xf32>
    %c227 = arith.constant 227 : index
    %c0_9 = arith.constant 0 : index
    %8 = vector.load %arg2[%c227, %c0_9] : memref<232x128xf32, #tpu.memory_space<vmem>>, vector<1x128xf32>
    %cst = arith.constant dense<0.000000e+00> : vector<8x32xf32>
    %9 = tpu.matmul %0, %1, %cst {dimension_numbers = #tpu.dot_dimension_numbers<[1], [0], [0], [1], [0, 0, 1, 1], [], []>} : vector<8x32xf32>, vector<32x32xf32>, vector<8x32xf32> -> vector<8x32xf32>
    %10 = vector.broadcast %5 : vector<1x32xf32> to vector<8x32xf32>
    %11 = arith.addf %9, %10 : vector<8x32xf32>
    %cst_10 = arith.constant 0.000000e+00 : f32
    %12 = vector.broadcast %cst_10 : f32 to vector<8x32xf32>
    %13 = arith.maximumf %11, %12 : vector<8x32xf32>
    %cst_11 = arith.constant dense<0.000000e+00> : vector<8x32xf32>
    %14 = tpu.matmul %13, %2, %cst_11 {dimension_numbers = #tpu.dot_dimension_numbers<[1], [0], [0], [1], [0, 0, 1, 1], [], []>} : vector<8x32xf32>, vector<32x32xf32>, vector<8x32xf32> -> vector<8x32xf32>
    %15 = vector.broadcast %6 : vector<1x32xf32> to vector<8x32xf32>
    %16 = arith.addf %14, %15 : vector<8x32xf32>
    %17 = arith.mulf %16, %16 : vector<8x32xf32>
    %cst_12 = arith.constant dense<0.000000e+00> : vector<8xf32>
    %18 = vector.multi_reduction <add>, %17, %cst_12 [1] : vector<8x32xf32> to vector<8xf32>
    %19 = vector.shape_cast %18 : vector<8xf32> to vector<8x1xf32>
    %cst_13 = arith.constant 1.000000e-24 : f32
    %20 = vector.broadcast %cst_13 : f32 to vector<8x1xf32>
    %21 = arith.maximumf %19, %20 : vector<8x1xf32>
    %22 = math.rsqrt %21 : vector<8x1xf32>
    %23 = vector.broadcast %22 : vector<8x1xf32> to vector<8x32xf32>
    %24 = arith.mulf %16, %23 : vector<8x32xf32>
    %c0_14 = arith.constant 0 : index
    %c0_15 = arith.constant 0 : index
    %25 = vector.load %arg1[%c0_14, %c0_15] : memref<8x32xf32, #tpu.memory_space<vmem>>, vector<8x32xf32>
    %26 = arith.addf %24, %25 : vector<8x32xf32>
    %cst_16 = arith.constant dense<0.000000e+00> : vector<8x128xf32>
    %27 = tpu.matmul %26, %3, %cst_16 {dimension_numbers = #tpu.dot_dimension_numbers<[1], [0], [0], [1], [0, 0, 1, 1], [], []>} : vector<8x32xf32>, vector<32x128xf32>, vector<8x128xf32> -> vector<8x128xf32>
    %28 = vector.broadcast %7 : vector<1x128xf32> to vector<8x128xf32>
    %29 = arith.addf %27, %28 : vector<8x128xf32>
    %cst_17 = arith.constant 0.000000e+00 : f32
    %30 = vector.broadcast %cst_17 : f32 to vector<8x128xf32>
    %31 = arith.maximumf %29, %30 : vector<8x128xf32>
    %cst_18 = arith.constant dense<0.000000e+00> : vector<8x128xf32>
    %32 = tpu.matmul %31, %4, %cst_18 {dimension_numbers = #tpu.dot_dimension_numbers<[1], [0], [0], [1], [0, 0, 1, 1], [], []>} : vector<8x128xf32>, vector<128x128xf32>, vector<8x128xf32> -> vector<8x128xf32>
    %33 = vector.broadcast %8 : vector<1x128xf32> to vector<8x128xf32>
    %34 = arith.addf %32, %33 : vector<8x128xf32>
    %cst_19 = arith.constant 0.000000e+00 : f32
    %35 = vector.broadcast %cst_19 : f32 to vector<8x96xf32>
    %36 = tpu.concatenate %26, %35 in 1 : vector<8x32xf32>, vector<8x96xf32> -> vector<8x128xf32>
    %37 = tpu.concatenate %36, %31, %34 in 1 : vector<8x128xf32>, vector<8x128xf32>, vector<8x128xf32> -> vector<8x384xf32>
    %c0_20 = arith.constant 0 : index
    %c0_21 = arith.constant 0 : index
    %38 = vector.load %arg3[%c0_20, %c0_21] : memref<8x384xf32, #tpu.memory_space<vmem>>, vector<8x384xf32>
    tpu.vector_store %arg3[%c0_20, %c0_21], %37 {strides = array<i32>} : memref<8x384xf32, #tpu.memory_space<vmem>>, vector<8x384xf32>,
    return
  }
}

</mosaic_0001>

<bundles_post_ra>
// kernel: tpu_custom_call.1
= control target key start
LH: loop header
LB: loop body
LE: loop exit
PB: predicated region body
PF: predicated region fallthrough
CT: control target
= control target key end

     0   :  { %8 = vsyncpa [#allocation3], 0  ;;  %s776_s0 = inlined_call_operand.hbm [shape: f32[8,32], index: 0, kind: input, shape index: {}]   ;;  %s777_s1 = inlined_call_operand.hbm [shape: f32[8,32], index: 1, kind: input, shape index: {}]   ;;  %s778_s2 = inlined_call_operand.hbm [shape: f32[232,128], index: 2, kind: input, shape index: {}]   ;;  %s779_s3 = inlined_call_operand.hbm [shape: f32[8,384], index: 3, kind: output, shape index: {}]  }
   0x1   :  { %9 = vsyncpa [#allocation6], 0 }
   0x2   :  { %10 = vsyncpa [#allocation4], 0  ;;  %s676_s12 = smov [#allocation5]   ;;  %s677_s14 = smov [#allocation2]  }
   0x3   :  { %s27_s13 = sshll.u32 %s676_s12, 4  ;;  %s17_s15 = sshll.u32 %s677_s14, 4  ;;  %s28_s13 = int_to_ptr.vmem [resolvable:$true] %s27_s13  ;;  %s18_s15 = int_to_ptr.vmem [resolvable:$true] %s17_s15 }
   0x4   :  { %s582_s18 = scalar_lea.hbm %s777_s1, 128 }
   0x5   :  { %p583_p0 = scmp.ne.s32.totalorder %s777_s1, %s582_s18  ;;  %p586_p1 = scmp.lt.u32.totalorder %s582_s18, %s777_s1 }
   0x7   :  { %p588_p2 = pnand %p586_p1, %p583_p0 }
   0x9   :  { %591 = shalt.err (!%p588_p2)
}
   0xa   :  { %s592_s23 = scalar_lea.vmem %s28_s13, 128  ;;  %p597_p4 = scmp.lt.s32.totalorder %s28_s13, %s28_s13 }
   0xb   :  { %p593_p3 = scmp.ne.s32.totalorder %s28_s13, %s592_s23  ;;  %p598_p5 = scmp.lt.s32.totalorder %s592_s23, %s592_s23 }
   0xd   :  { %p599_p6 = por %p598_p5, %p597_p4 }
   0xf   :  { %p600_p7 = pnand %p599_p6, %p593_p3 }
  0x11   :  { %603 = shalt.err (!%p600_p7)
}
  0x12   :  { %30 = dma.hbm_to_vmem [thread:$0]  %s777_s1, 128, %s28_s13, [#allocation6]  }
  0x13   :  { %s604_s28 = scalar_lea.hbm %s776_s0, 128 }
  0x14   :  { %p605_p8 = scmp.ne.s32.totalorder %s776_s0, %s604_s28  ;;  %p608_p9 = scmp.lt.u32.totalorder %s604_s28, %s776_s0 }
  0x16   :  { %p610_p10 = pnand %p608_p9, %p605_p8 }
  0x18   :  { %613 = shalt.err (!%p610_p10)
}
  0x19   :  { %s614_s6 = scalar_lea.vmem %s18_s15, 128  ;;  %p619_p12 = scmp.lt.s32.totalorder %s18_s15, %s18_s15 }
  0x1a   :  { %p615_p11 = scmp.ne.s32.totalorder %s18_s15, %s614_s6  ;;  %p620_p13 = scmp.lt.s32.totalorder %s614_s6, %s614_s6 }
  0x1c   :  { %p621_p0 = por %p620_p13, %p619_p12 }
  0x1e   :  { %p622_p1 = pnand %p621_p0, %p615_p11 }
  0x20   :  { %625 = shalt.err (!%p622_p1)
}
  0x21   :  { %20 = dma.hbm_to_vmem [thread:$0]  %s776_s0, 128, %s18_s15, [#allocation3]  }
  0x22   :  { %s678_s8 = smov [#allocation7]   ;;  %s626_s12 = scalar_lea.hbm %s778_s2, 3712 }
  0x23   :  { %s36_s9 = sshll.u32 %s678_s8, 4  ;;  %p627_p2 = scmp.ne.s32.totalorder %s778_s2, %s626_s12  ;;  %s37_s9 = int_to_ptr.vmem [resolvable:$true] %s36_s9 }
  0x24   :  { %p630_p3 = scmp.lt.u32.totalorder %s626_s12, %s778_s2 }
  0x26   :  { %p632_p4 = pnand %p630_p3, %p627_p2 }
  0x28   :  { %635 = shalt.err (!%p632_p4)
}
  0x29   :  { %s636_s18 = scalar_lea.vmem %s37_s9, 3712  ;;  %p641_p6 = scmp.lt.s32.totalorder %s37_s9, %s37_s9 }
  0x2a   :  { %p637_p5 = scmp.ne.s32.totalorder %s37_s9, %s636_s18  ;;  %p642_p7 = scmp.lt.s32.totalorder %s636_s18, %s636_s18 }
  0x2c   :  { %p643_p8 = por %p642_p7, %p641_p6 }
  0x2e   :  { %p644_p9 = pnand %p643_p8, %p637_p5 }
  0x30   :  { %647 = shalt.err (!%p644_p9)
}
  0x31   :  { %s679_s0 = smov 128   ;;  %s680_s15 = smov 8  }
  0x32   :  { %42 = dma.hbm_to_vmem [thread:$0]  %s778_s2, 3712, %s37_s9, [#allocation6], %s679_s0, %s679_s0, %s680_s15  }
  0x33   :  { %670 = dma.done.wait [#allocation3], 128  }
  0x34   :  { %671 = vsyncadd [#allocation3], 4294967168 }
  0x35   :  { %672 = dma.done.wait [#allocation6], 3840  }
  0x36   :  { %673 = vsyncadd [#allocation6], 4294963456  ;;  %v681_v0 = vmov 0.0|0.0   ;;  %vm682_vm0 = vmmov 0   ;;  %v683_v1 = vmov 0.0   ;;  %v53_v2 = vld [vmem:[#allocation7] sm:$0xff] }
  0x37   :  { %529 = vmatprep.subr.bf16.mxu0 %v681_v0  ;;  %469 = vmatprep.mubr.msk.f32.mxu0 %vm682_vm0, %v683_v1  ;;  %v54_v3 = vld [vmem:[#allocation7 + $0x8] sm:$0xff]  ;;  %v55_v4 = vld [vmem:[#allocation7 + $0x10] sm:$0xff]  ;;  %v56_v6 = vld [vmem:[#allocation7 + $0x18] sm:$0xff]  ;;  %vm89_vm1 = vcmask 261120   ;;  %s684_s2 = smov [#allocation8]  }
  0x38   :  { %547 = vmatprep.subr.bf16.mxu1 %v681_v0  ;;  %526 = vmatprep.mubr.msk.f32.mxu1 %vm682_vm0, %v683_v1  ;;  %v530_v5 = vpack.c.bf16 %v54_v3, %v53_v2  ;;  %v533_v7 = vpack.c.bf16 %v56_v6, %v55_v4  ;;  %v57_v8 = vld [vmem:[#allocation7 + $0x20] sm:$0xff]  ;;  %v58_v9 = vld [vmem:[#allocation7 + $0x28] sm:$0xff]  ;;  %v52_v10 = vld [vmem:[#allocation2] sm:$0xff]  ;;  %s412_s21 = sshll.u32 %s684_s2, 4  ;;  %s413_s21 = int_to_ptr.vmem [resolvable:$true] %s412_s21 }
  0x39   :  { %v536_v11 = vpack.c.bf16 %v58_v9, %v57_v8  ;;  %v59_v12 = vld [vmem:[#allocation7 + $0x30] sm:$0xff]  ;;  %v60_v13 = vld [vmem:[#allocation7 + $0x38] sm:$0xff]  ;;  %v422_v15 = vld [vmem:[#allocation7 + $0xe0] ss:$0 sm:$0xff]  ;;  %s648_s22 = scalar_lea.vmem %s413_s21, 384  ;;  %p653_p11 = scmp.lt.s32.totalorder %s413_s21, %s413_s21 }
  0x3a   :  { %531 = vmatpush3.bf16.msra.mxu0 %v530_v5  ;;  %v539_v14 = vpack.c.bf16 %v60_v13, %v59_v12  ;;  %v424_v20 = vld [vmem:[#allocation7 + $0xe1] ss:$0 sm:$0xff]  ;;  %v62_v27 = vld [vmem:[#allocation7 + $0x48] sm:$0xff]  ;;  %v63_v29 = vld [vmem:[#allocation7 + $0x50] sm:$0xff]  ;;  %p649_p10 = scmp.ne.s32.totalorder %s413_s21, %s648_s22  ;;  %p654_p12 = scmp.lt.s32.totalorder %s648_s22, %s648_s22 }
  0x3b   :  { %532 = vmatprep.subr.bf16.mxu0 %v681_v0  ;;  %v61_v26 = vld [vmem:[#allocation7 + $0x40] sm:$0xff]  ;;  %v64_v30 = vld [vmem:[#allocation7 + $0x58] sm:$0xff]  ;;  %v66_v33 = vld [vmem:[#allocation7 + $0x68] sm:$0xff] }
  0x3c   :  { %v542_v28 = vpack.c.bf16 %v62_v27, %v61_v26  ;;  %v545_v31 = vpack.c.bf16 %v64_v30, %v63_v29  ;;  %v65_v32 = vld [vmem:[#allocation7 + $0x60] sm:$0xff]  ;;  %v67_v34 = vld [vmem:[#allocation7 + $0x70] sm:$0xff]  ;;  %v68_v36 = vld [vmem:[#allocation7 + $0x78] sm:$0xff]  ;;  %p655_p13 = por %p654_p12, %p653_p11 }
  0x3d   :  { %v548_v35 = vpack.c.bf16 %v66_v33, %v65_v32  ;;  %v551_v37 = vpack.c.bf16 %v68_v36, %v67_v34  ;;  %v69_v38 = vld [vmem:[#allocation7 + $0x80] sm:$0xff]  ;;  %v70_v39 = vld [vmem:[#allocation7 + $0x88] sm:$0xff]  ;;  %v71_v41 = vld [vmem:[#allocation7 + $0x90] sm:$0xff] }
  0x3e   :  { %534 = vmatpush3.bf16.msra.mxu0 %v533_v7  ;;  %v554_v40 = vpack.c.bf16 %v70_v39, %v69_v38  ;;  %v72_v42 = vld [vmem:[#allocation7 + $0x98] sm:$0xff]  ;;  %v73_v44 = vld [vmem:[#allocation7 + $0xa0] sm:$0xff]  ;;  %v74_v45 = vld [vmem:[#allocation7 + $0xa8] sm:$0xff]  ;;  %p656_p0 = pnand %p655_p13, %p649_p10 }
  0x3f   :  { %535 = vmatprep.subr.bf16.mxu0 %v681_v0  ;;  %549 = vmatpush3.bf16.msra.mxu1 %v548_v35  ;;  %v557_v43 = vpack.c.bf16 %v72_v42, %v71_v41  ;;  %v560_v46 = vpack.c.bf16 %v74_v45, %v73_v44  ;;  %v75_v47 = vld [vmem:[#allocation7 + $0xb0] sm:$0xff]  ;;  %v76_v48 = vld [vmem:[#allocation7 + $0xb8] sm:$0xff]  ;;  %v77_v50 = vld [vmem:[#allocation7 + $0xc0] sm:$0xff] }
  0x40   :  { %550 = vmatprep.subr.bf16.mxu1 %v681_v0  ;;  %v563_v49 = vpack.c.bf16 %v76_v48, %v75_v47  ;;  %v78_v51 = vld [vmem:[#allocation7 + $0xc8] sm:$0xff]  ;;  %v248_v56 = vld [vmem:[#allocation5] sm:$0xff]  ;;  %v79_v60 = vld [vmem:[#allocation7 + $0xd0] sm:$0xff] }
  0x41   :  { %470 = vmatmul.mubr.msk.f32.vlgmr.msra.gmra.mrb[0].mxu0 %vm89_vm1, %v52_v10  ;;  %v566_v52 = vpack.c.bf16 %v78_v51, %v77_v50  ;;  %v80_v61 = vld [vmem:[#allocation7 + $0xd8] sm:$0xff]  ;;  %v426_v63 = vld [vmem:[#allocation7 + $0xe2] ss:$0 sm:$0xff]  ;;  %v428_v4 = vld [vmem:[#allocation7 + $0xe3] ss:$0 sm:$0xff] }
  0x42   :  { %537 = vmatpush3.bf16.msra.mxu0 %v536_v11  ;;  %480 = vmatprep.mubr.msk.f32.mxu0 %vm682_vm0, %v683_v1  ;;  %v569_v62 = vpack.c.bf16 %v80_v61, %v79_v60 }
  0x43   :  { %538 = vmatprep.subr.bf16.mxu0 %v681_v0  ;;  %552 = vmatpush3.bf16.msra.mxu1 %v551_v37 }
  0x44   :  { %553 = vmatprep.subr.bf16.mxu1 %v681_v0 }
  0x46   :  { %540 = vmatpush3.bf16.msra.mxu0 %v539_v14 }
  0x47   :  { %541 = vmatprep.subr.bf16.mxu0 %v681_v0  ;;  %555 = vmatpush3.bf16.msra.mxu1 %v554_v40 }
  0x48   :  { %556 = vmatprep.subr.bf16.mxu1 %v681_v0 }
  0x4b   :  { %558 = vmatpush3.bf16.msra.mxu1 %v557_v43 }
  0x4c   :  { %559 = vmatprep.subr.bf16.mxu1 %v681_v0 }
  0x4f   :  { %561 = vmatpush3.bf16.msra.mxu1 %v560_v46 }
  0x50   :  { %562 = vmatprep.subr.bf16.mxu1 %v681_v0 }
  0x53   :  { %564 = vmatpush3.bf16.msra.mxu1 %v563_v49 }
  0x54   :  { %565 = vmatprep.subr.bf16.mxu1 %v681_v0 }
  0x57   :  { %567 = vmatpush3.bf16.msra.mxu1 %v566_v52 }
  0x58   :  { %568 = vmatprep.subr.bf16.mxu1 %v681_v0 }
  0x5b   :  { %570 = vmatpush3.bf16.msra.mxu1 %v569_v62 }
 0x114   :  { %v159_v16 = vpop.f32.mrb[0].mxu0 }
 0x115   :  { %v160_v17 = vadd.f32 %v422_v15, %v159_v16  ;;  %v471_v18 = vpop.f32.mrb[1].mxu0 }
 0x117   :  { %v163_v19 = vmax.f32 %v160_v17, 0.0 }
 0x119   :  { %481 = vmatmul.mubr.msk.f32.vlgmr.msra.gmra.mrb[2].mxu0 %vm89_vm1, %v163_v19 }
 0x11a   :  { %491 = vmatprep.mubr.msk.f32.mxu0 %vm682_vm0, %v683_v1  ;;  %543 = vmatpush3.bf16.msra.mxu0 %v542_v28 }
 0x11b   :  { %544 = vmatprep.subr.bf16.mxu0 %v681_v0 }
 0x11e   :  { %546 = vmatpush3.bf16.msra.mxu0 %v545_v31 }
 0x1ec   :  { %v237_v21 = vpop.f32.mrb[2].mxu0 }
 0x1ed   :  { %v238_v22 = vadd.f32 %v424_v20, %v237_v21  ;;  %v482_v23 = vpop.f32.mrb[3].mxu0 }
 0x1ef   :  { %v241_v24 = vmul.f32 %v238_v22, %v238_v22 }
 0x1f1   :  { %v242_v25 = vsel %vm89_vm1, %v241_v24, 0.0 }
 0x1f2   :  { %243 = vadd.xlane.f32.xlu0 %v242_v25 }
 0x27f   :  { %v244_v53 = vpop.xlane.xlu0 %243 }
 0x280   :  { %v245_v54 = vmax.f32 %v244_v53, 1e-24 }
 0x282   :  { %580 = vrsqrt.f32 %v245_v54 }
 0x28c   :  { %v581_v55 = vpop.eup %580 }
 0x28d   :  { %v247_v57 = vmul.f32 %v581_v55, %v238_v22 }
 0x28f   :  { %v249_v58 = vadd.f32 %v248_v56, %v247_v57 }
 0x291   :  { %492 = vmatmul.mubr.msk.f32.vlgmr.msra.gmra.mrb[4].mxu0 %vm89_vm1, %v249_v58  ;;  %v402_v59 = vsel %vm89_vm1, %v249_v58, 0.0 }
 0x292   :  { %403 = vst [vmem:[#allocation8] sm:$0xff] %v402_v59 }
 0x364   :  { %v323_v1 = vpop.f32.mrb[4].mxu0 }
 0x365   :  { %v324_v2 = vadd.f32 %v426_v63, %v323_v1  ;;  %v493_v0 = vpop.f32.mrb[5].mxu0 }
 0x367   :  { %v327_v3 = vmax.f32 %v324_v2, 0.0 }
 0x369   :  { %404 = vst [vmem:[#allocation8 + $0x8] sm:$0xff] %v327_v3  ;;  %527 = vmatmul.mubr.f32.vlgmr.msra.gmra.mrb[0].mxu1 %v327_v3 }
 0x43c   :  { %v398_v5 = vpop.f32.mrb[0].mxu1 }
 0x43d   :  { %v399_v6 = vadd.f32 %v428_v4, %v398_v5  ;;  %v528_v7 = vpop.f32.mrb[1].mxu1 }
 0x43f   :  { %405 = vst [vmem:[#allocation8 + $0x10] sm:$0xff] %v399_v6 }
 0x440   :  { %659 = shalt.err (!%p656_p0)
}
 0x441   :  { %s660_s25 = scalar_lea.hbm %s779_s3, 384 }
 0x442   :  { %p661_p1 = scmp.ne.s32.totalorder %s779_s3, %s660_s25  ;;  %p664_p2 = scmp.lt.u32.totalorder %s660_s25, %s779_s3 }
 0x444   :  { %p666_p3 = pnand %p664_p2, %p661_p1 }
 0x446   :  { %669 = shalt.err (!%p666_p3)
}
 0x447   :  { %415 = dma.vmem_to_hbm [thread:$0]  %s413_s21, 384, %s779_s3, [#allocation4]  }
 0x448   :  { %674 = dma.done.wait [#allocation4], 384  }
 0x449   :  { %675 = vsyncadd [#allocation4], 4294966912 }
 0x44a   :  { %419 = vsyncpa [#allocation3], 1 }
 0x44b   :  { %420 = vsyncpa [#allocation6], 1 }
 0x44c   :  { %421 = vsyncpa [#allocation4], 1 }

</bundles_post_ra>
